<compile_context>
chip_gen: v7x
topology: tpu7x:2x2x1
jax: 0.10.0
libtpu: 0.0.40
codegen_flags: <defaults>
</compile_context>

<pallas_src>
import jax
import jax.numpy as jnp
from jax.experimental import pallas as pl
from jax.experimental.pallas import tpu as pltpu


def _round_up(x, m):
    return ((x + m - 1) // m) * m


def _head_matmul_kernel(x_ref, w_ref, o_ref):
    # logits tile = x_bf16 @ W_bf16 with f32 accumulation on the MXU.
    o_ref[...] = jnp.dot(
        x_ref[...], w_ref[...], preferred_element_type=jnp.float32
    ).astype(o_ref.dtype)


def prepare_out_head(w_out, *, tv=2048):
    """One-time re-layout of the torch Linear weight (hoisted out of forward).

    w_out: (vocab_size, E) f32  -- torch nn.Linear(E, vocab, bias=False).weight
    returns: ((E, Vp) bf16 padded weight, TV vocab tile size)
    """
    V, E = w_out.shape
    TV = tv if V >= tv else _round_up(V, 128)
    Vp = _round_up(V, TV)
    w_t = jnp.pad(w_out.T.astype(jnp.bfloat16), ((0, 0), (0, Vp - V)))
    return w_t, TV


def dummy_gpt_forward(in_idx, tok_emb, pos_emb, w_t, *, vocab_size, tv, tm=512):
    """DummyGPTModel forward.

    in_idx : (B, S) int32 token ids
    tok_emb: (vocab_size, E) f32 token-embedding table
    pos_emb: (context_length, E) f32 positional-embedding table
    w_t    : (E, Vp) bf16 pre-laid-out output-head weight (see prepare_out_head)
    returns: (B, S, vocab_size) f32 logits
    """
    B, S = in_idx.shape
    E, Vp = w_t.shape
    V = vocab_size
    M = B * S
    TV = tv
    assert Vp % TV == 0

    # ---- embeddings (wrapper side) ------------------------------------------
    # TODO(synk): the data-dependent token-id row gather has no clean single
    # BlockSpec expression (it would need one manual DMA per row), so it stays
    # as jnp.take; XLA fuses gather + pos add + bf16 cast into one pass.
    # TODO(synk): nn.Dropout(drop_rate) is treated as eval-mode identity.
    tok = jnp.take(tok_emb, in_idx.reshape(-1), axis=0)           # (M, E) f32
    pos = jnp.tile(pos_emb[:S], (B, 1))                           # (M, E) f32
    x = (tok + pos).astype(jnp.bfloat16)                          # (M, E) bf16

    # ---- tile sizes / padding (lane-dense, unmasked stores) ------------------
    TM = tm if M >= tm else _round_up(M, 16)   # bf16 packs 16 sublanes / vreg
    Mp = _round_up(M, TM)
    x = jnp.pad(x, ((0, Mp - M), (0, 0)))

    grid = (Vp // TV, Mp // TM)   # vocab OUTER -> weight tile stationary

    cost = pl.CostEstimate(
        flops=2 * Mp * E * Vp,
        transcendentals=0,
        bytes_accessed=(
            E * Vp * 2                      # weight: exactly one full pass
            + Mp * E * 2 * (Vp // TV)       # activation: re-read per vocab tile
            + Mp * Vp * 4                   # f32 logits writeback
        ),
    )

    out = pl.pallas_call(
        _head_matmul_kernel,
        out_shape=jax.ShapeDtypeStruct((Mp, Vp), jnp.float32),
        grid_spec=pltpu.PrefetchScalarGridSpec(
            num_scalar_prefetch=0,
            grid=grid,
            in_specs=[
                # activation tile: changes with inner M index only
                pl.BlockSpec((TM, E), lambda j, i: (i, 0)),
                # weight tile: constant over the inner M loop (stationary)
                pl.BlockSpec((E, TV), lambda j, i: (0, j)),
            ],
            out_specs=pl.BlockSpec((TM, TV), lambda j, i: (i, j)),
        ),
        compiler_params=pltpu.CompilerParams(
            # Leading V axis "parallel": on v7x each TensorCore gets a disjoint
            # half of the weight / output.  M is "arbitrary" (no accumulation,
            # so still correct) to force the megacore split onto V.
            dimension_semantics=("parallel", "arbitrary"),
            vmem_limit_bytes=48 * 1024 * 1024,
        ),
        cost_estimate=cost,
    )(x, w_t)

    return out[:M, :V].reshape(B, S, V)


def dummy_gpt_ref(in_idx, tok_emb, pos_emb, w_out):
    S = in_idx.shape[1]
    x = tok_emb[in_idx] + pos_emb[:S][None, :, :]
    return jnp.einsum("bse,ve->bsv", x, w_out)


if __name__ == "__main__":
    # Small shapes consistent with the module (emb_dim / vocab scaled down).
    cfg = {"vocab_size": 1024, "context_length": 64, "emb_dim": 128}
    B, S = 2, 8

    key = jax.random.PRNGKey(0)
    k_idx, k_tok, k_pos, k_w = jax.random.split(key, 4)

    in_idx = jax.random.randint(k_idx, (B, S), 0, cfg["vocab_size"], dtype=jnp.int32)
    tok_emb = jax.random.normal(k_tok, (cfg["vocab_size"], cfg["emb_dim"]), jnp.float32)
    pos_emb = jax.random.normal(k_pos, (cfg["context_length"], cfg["emb_dim"]), jnp.float32)
    w_out = jax.random.normal(
        k_w, (cfg["vocab_size"], cfg["emb_dim"]), jnp.float32
    ) / jnp.sqrt(cfg["emb_dim"])

    # One-time weight re-layout (hoisted out of the per-call path).
    w_t, TV = prepare_out_head(w_out)

    fwd = jax.jit(dummy_gpt_forward, static_argnames=("vocab_size", "tv", "tm"))
    logits = fwd(in_idx, tok_emb, pos_emb, w_t, vocab_size=cfg["vocab_size"], tv=TV)
    jax.block_until_ready(logits)

    ref = dummy_gpt_ref(in_idx, tok_emb, pos_emb, w_out)
    assert logits.shape == (B, S, cfg["vocab_size"])
    # bf16 MXU operands with f32 accumulation -> loosened tolerance vs f32 ref.
    err = float(jnp.max(jnp.abs(logits - ref)))
    assert jnp.allclose(logits, ref, atol=5e-2, rtol=5e-2), err

    print("KERNEL_OK")
</pallas_src>

<mosaic_0001>
module attributes {stable_mosaic.version = 11 : i64} {
  func.func @_head_matmul_kernel(%arg0: i32, %arg1: i32, %arg2: memref<16x128xbf16, #tpu.memory_space<vmem>>, %arg3: memref<128x1024xbf16, #tpu.memory_space<vmem>>, %arg4: memref<16x1024xf32, #tpu.memory_space<vmem>>) attributes {dimension_semantics = [#tpu.dimension_semantics<parallel>, #tpu.dimension_semantics<arbitrary>], iteration_bounds = array<i64: 1, 1>, scalar_prefetch = 0 : i64, scratch_operands = 0 : i64, tpu.core_type = #tpu.core_type<tc>, window_params = [{transform_indices = @transform_0, window_bounds = array<i64: 16, 128>}, {transform_indices = @transform_1, window_bounds = array<i64: 128, 1024>}, {transform_indices = @transform_2, window_bounds = array<i64: 16, 1024>}]} {
    %c0 = arith.constant 0 : index
    %c0_0 = arith.constant 0 : index
    %0 = vector.load %arg2[%c0, %c0_0] : memref<16x128xbf16, #tpu.memory_space<vmem>>, vector<16x128xbf16>
    %c0_1 = arith.constant 0 : index
    %c0_2 = arith.constant 0 : index
    %1 = vector.load %arg3[%c0_1, %c0_2] : memref<128x1024xbf16, #tpu.memory_space<vmem>>, vector<128x1024xbf16>
    %cst = arith.constant dense<0.000000e+00> : vector<16x1024xf32>
    %2 = tpu.matmul %0, %1, %cst {dimension_numbers = #tpu.dot_dimension_numbers<[1], [0], [0], [1], [0, 0, 1, 1], [], []>} : vector<16x128xbf16>, vector<128x1024xbf16>, vector<16x1024xf32> -> vector<16x1024xf32>
    %c0_3 = arith.constant 0 : index
    %c0_4 = arith.constant 0 : index
    %3 = vector.load %arg4[%c0_3, %c0_4] : memref<16x1024xf32, #tpu.memory_space<vmem>>, vector<16x1024xf32>
    tpu.vector_store %arg4[%c0_3, %c0_4], %2 {strides = array<i32>} : memref<16x1024xf32, #tpu.memory_space<vmem>>, vector<16x1024xf32>,
    return
  }
  func.func @transform_0(%arg0: i32, %arg1: i32) -> (i32, i32) {
    %c0_i32 = arith.constant 0 : i32
    %c0_i32_0 = arith.constant 0 : i32
    return %arg1, %c0_i32 : i32, i32
  }
  func.func @transform_1(%arg0: i32, %arg1: i32) -> (i32, i32) {
    %c0_i32 = arith.constant 0 : i32
    %c0_i32_0 = arith.constant 0 : i32
    return %c0_i32, %arg0 : i32, i32
  }
  func.func @transform_2(%arg0: i32, %arg1: i32) -> (i32, i32) {
    %c0_i32 = arith.constant 0 : i32
    return %arg1, %arg0 : i32, i32
  }
}

</mosaic_0001>

<bundles_post_ra>
// kernel: dummy_gpt_forward.1
= control target key start
LH: loop header
LB: loop body
LE: loop exit
PB: predicated region body
PF: predicated region fallthrough
CT: control target
= control target key end

     0   :  { %7 = vsyncpa [#allocation3], 0  ;;  %s804_s0 = inlined_call_operand.vmem [shape: bf16[16,128], index: 0, kind: input, shape index: {}]   ;;  %s805_s1 = inlined_call_operand.hbm [shape: bf16[128,1024], index: 1, kind: input, shape index: {}]   ;;  %s806_s2 = inlined_call_operand.hbm [shape: f32[16,1024], index: 2, kind: output, shape index: {}]  }
   0x1   :  { %8 = vsyncpa [#allocation4], 0  ;;  %s745_s9 = smov [#allocation2]   ;;  %s697_s13 = scalar_lea.hbm %s805_s1, 8192 }
   0x2   :  { %s16_s10 = sshll.u32 %s745_s9, 4  ;;  %p698_p0 = scmp.ne.s32.totalorder %s805_s1, %s697_s13  ;;  %s17_s10 = int_to_ptr.vmem [resolvable:$true] %s16_s10 }
   0x3   :  { %p701_p1 = scmp.lt.u32.totalorder %s697_s13, %s805_s1 }
   0x5   :  { %p703_p2 = pnand %p701_p1, %p698_p0 }
   0x7   :  { %706 = shalt.err (!%p703_p2)
}
   0x8   :  { %s707_s18 = scalar_lea.vmem %s17_s10, 8192  ;;  %p712_p4 = scmp.lt.s32.totalorder %s17_s10, %s17_s10 }
   0x9   :  { %p708_p3 = scmp.ne.s32.totalorder %s17_s10, %s707_s18  ;;  %p713_p5 = scmp.lt.s32.totalorder %s707_s18, %s707_s18 }
   0xb   :  { %p714_p6 = por %p713_p5, %p712_p4 }
   0xd   :  { %p715_p7 = pnand %p714_p6, %p708_p3 }
   0xf   :  { %718 = shalt.err (!%p715_p7)
}
  0x10   :  { %s746_s19 = smov 512   ;;  %s747_s20 = smov 32  }
  0x11   :  { %22 = dma.hbm_to_vmem [thread:$0]  %s805_s1, 8192, %s17_s10, [#allocation3], %s746_s19, %s746_s19, %s747_s20  }
  0x12   :  { %741 = dma.done.wait [#allocation3], 8192  }
  0x13   :  { %742 = vsyncadd [#allocation3], 4294959104  ;;  %v748_v0 = vmov 0   ;;  %v29_v1 = vld [vmem:[#allocation2] sm:$0xff]  ;;  %v30_v3 = vld [vmem:[#allocation2 + $0x8] sm:$0xff] }
  0x14   :  { %451 = vmatprep.mubr.bf16.mxu0 %v748_v0  ;;  %494 = vmatprep.mubr.bf16.mxu1 %v748_v0  ;;  %v33_v2 = vld [vmem:[#allocation2 + $0x20] sm:$0xff]  ;;  %v34_v5 = vld [vmem:[#allocation2 + $0x28] sm:$0xff]  ;;  %v31_v63 = vld [vmem:[#allocation2 + $0x10] sm:$0xff] }
  0x15   :  { %v626_v4 = vcombine.high %v29_v1, %v33_v2  ;;  %v625_v6 = vcombine.low %v29_v1, %v33_v2  ;;  %v37_v7 = vld [vmem:[#allocation2 + $0x40] sm:$0xff]  ;;  %v628_v9 = vcombine.high %v30_v3, %v34_v5  ;;  %v627_v10 = vcombine.low %v30_v3, %v34_v5  ;;  %v38_v12 = vld [vmem:[#allocation2 + $0x48] sm:$0xff]  ;;  %v35_v1 = vld [vmem:[#allocation2 + $0x30] sm:$0xff] }
  0x16   :  { %v41_v8 = vld [vmem:[#allocation2 + $0x60] sm:$0xff]  ;;  %v42_v13 = vld [vmem:[#allocation2 + $0x68] sm:$0xff]  ;;  %v32_v2 = vld [vmem:[#allocation2 + $0x18] sm:$0xff] }
  0x17   :  { %v634_v11 = vcombine.high %v37_v7, %v41_v8  ;;  %v45_v14 = vld [vmem:[#allocation2 + $0x80] sm:$0xff]  ;;  %419 = vmatprep.subr.bf16.mxu0 %v626_v4  ;;  %v636_v15 = vcombine.high %v38_v12, %v42_v13  ;;  %v46_v17 = vld [vmem:[#allocation2 + $0x88] sm:$0xff]  ;;  %462 = vmatprep.subr.bf16.mxu1 %v628_v9  ;;  %v633_v19 = vcombine.low %v37_v7, %v41_v8  ;;  %v36_v3 = vld [vmem:[#allocation2 + $0x38] sm:$0xff] }
  0x18   :  { %v49_v16 = vld [vmem:[#allocation2 + $0xa0] sm:$0xff]  ;;  %v50_v18 = vld [vmem:[#allocation2 + $0xa8] sm:$0xff]  ;;  %420 = vmatpush1.bf16.msra.mxu0 %v625_v6  ;;  %463 = vmatpush1.bf16.msra.mxu1 %v627_v10  ;;  %v635_v20 = vcombine.low %v38_v12, %v42_v13  ;;  %v630_v6 = vcombine.high %v31_v63, %v35_v1  ;;  %v632_v7 = vcombine.high %v32_v2, %v36_v3  ;;  %v39_v8 = vld [vmem:[#allocation2 + $0x50] sm:$0xff] }
  0x19   :  { %421 = vmatprep.subr.bf16.mxu0 %v634_v11  ;;  %v642_v21 = vcombine.high %v45_v14, %v49_v16  ;;  %464 = vmatprep.subr.bf16.mxu1 %v636_v15  ;;  %v644_v22 = vcombine.high %v46_v17, %v50_v18  ;;  %v53_v23 = vld [vmem:[#allocation2 + $0xc0] sm:$0xff]  ;;  %v54_v25 = vld [vmem:[#allocation2 + $0xc8] sm:$0xff]  ;;  %v641_v27 = vcombine.low %v45_v14, %v49_v16  ;;  %v43_v9 = vld [vmem:[#allocation2 + $0x70] sm:$0xff] }
  0x1a   :  { %v57_v24 = vld [vmem:[#allocation2 + $0xe0] sm:$0xff]  ;;  %v58_v26 = vld [vmem:[#allocation2 + $0xe8] sm:$0xff]  ;;  %v643_v28 = vcombine.low %v46_v17, %v50_v18  ;;  %v40_v11 = vld [vmem:[#allocation2 + $0x58] sm:$0xff]  ;;  %v629_v13 = vcombine.low %v31_v63, %v35_v1  ;;  %v631_v14 = vcombine.low %v32_v2, %v36_v3  ;;  %v638_v15 = vcombine.high %v39_v8, %v43_v9 }
  0x1b   :  { %v650_v29 = vcombine.high %v53_v23, %v57_v24  ;;  %v652_v30 = vcombine.high %v54_v25, %v58_v26  ;;  %v61_v31 = vld [vmem:[#allocation2 + $0x100] sm:$0xff]  ;;  %v62_v33 = vld [vmem:[#allocation2 + $0x108] sm:$0xff]  ;;  %v649_v35 = vcombine.low %v53_v23, %v57_v24  ;;  %v651_v36 = vcombine.low %v54_v25, %v58_v26  ;;  %v44_v12 = vld [vmem:[#allocation2 + $0x78] sm:$0xff] }
  0x1c   :  { %422 = vmatpush1.bf16.msra.mxu0 %v633_v19  ;;  %465 = vmatpush1.bf16.msra.mxu1 %v635_v20  ;;  %v65_v32 = vld [vmem:[#allocation2 + $0x120] sm:$0xff]  ;;  %v66_v34 = vld [vmem:[#allocation2 + $0x128] sm:$0xff]  ;;  %v640_v16 = vcombine.high %v40_v11, %v44_v12  ;;  %v47_v17 = vld [vmem:[#allocation2 + $0x90] sm:$0xff] }
  0x1d   :  { %423 = vmatprep.subr.bf16.mxu0 %v642_v21  ;;  %466 = vmatprep.subr.bf16.mxu1 %v644_v22  ;;  %v658_v37 = vcombine.high %v61_v31, %v65_v32  ;;  %v660_v38 = vcombine.high %v62_v33, %v66_v34  ;;  %v69_v39 = vld [vmem:[#allocation2 + $0x140] sm:$0xff]  ;;  %v70_v41 = vld [vmem:[#allocation2 + $0x148] sm:$0xff]  ;;  %v657_v43 = vcombine.low %v61_v31, %v65_v32  ;;  %v51_v18 = vld [vmem:[#allocation2 + $0xb0] sm:$0xff] }
  0x1e   :  { %v73_v40 = vld [vmem:[#allocation2 + $0x160] sm:$0xff]  ;;  %v74_v42 = vld [vmem:[#allocation2 + $0x168] sm:$0xff]  ;;  %v659_v44 = vcombine.low %v62_v33, %v66_v34  ;;  %v48_v19 = vld [vmem:[#allocation2 + $0x98] sm:$0xff]  ;;  %v637_v21 = vcombine.low %v39_v8, %v43_v9  ;;  %v639_v22 = vcombine.low %v40_v11, %v44_v12  ;;  %v646_v23 = vcombine.high %v47_v17, %v51_v18 }
  0x1f   :  { %v666_v45 = vcombine.high %v69_v39, %v73_v40  ;;  %v668_v46 = vcombine.high %v70_v41, %v74_v42  ;;  %v77_v47 = vld [vmem:[#allocation2 + $0x180] sm:$0xff]  ;;  %v78_v49 = vld [vmem:[#allocation2 + $0x188] sm:$0xff]  ;;  %v665_v51 = vcombine.low %v69_v39, %v73_v40  ;;  %v667_v52 = vcombine.low %v70_v41, %v74_v42  ;;  %v52_v20 = vld [vmem:[#allocation2 + $0xb8] sm:$0xff] }
  0x20   :  { %424 = vmatpush1.bf16.msra.mxu0 %v641_v27  ;;  %467 = vmatpush1.bf16.msra.mxu1 %v643_v28  ;;  %v81_v48 = vld [vmem:[#allocation2 + $0x1a0] sm:$0xff]  ;;  %v82_v50 = vld [vmem:[#allocation2 + $0x1a8] sm:$0xff]  ;;  %v648_v24 = vcombine.high %v48_v19, %v52_v20  ;;  %v55_v25 = vld [vmem:[#allocation2 + $0xd0] sm:$0xff] }
  0x21   :  { %425 = vmatprep.subr.bf16.mxu0 %v650_v29  ;;  %468 = vmatprep.subr.bf16.mxu1 %v652_v30  ;;  %v674_v53 = vcombine.high %v77_v47, %v81_v48  ;;  %v676_v54 = vcombine.high %v78_v49, %v82_v50  ;;  %v85_v55 = vld [vmem:[#allocation2 + $0x1c0] sm:$0xff]  ;;  %v86_v57 = vld [vmem:[#allocation2 + $0x1c8] sm:$0xff]  ;;  %v673_v59 = vcombine.low %v77_v47, %v81_v48  ;;  %v59_v26 = vld [vmem:[#allocation2 + $0xf0] sm:$0xff] }
  0x22   :  { %v89_v56 = vld [vmem:[#allocation2 + $0x1e0] sm:$0xff]  ;;  %v90_v58 = vld [vmem:[#allocation2 + $0x1e8] sm:$0xff]  ;;  %v675_v60 = vcombine.low %v78_v49, %v82_v50  ;;  %v56_v27 = vld [vmem:[#allocation2 + $0xd8] sm:$0xff]  ;;  %v645_v29 = vcombine.low %v47_v17, %v51_v18  ;;  %v647_v30 = vcombine.low %v48_v19, %v52_v20  ;;  %v654_v31 = vcombine.high %v55_v25, %v59_v26 }
  0x23   :  { %v682_v61 = vcombine.high %v85_v55, %v89_v56  ;;  %v684_v62 = vcombine.high %v86_v57, %v90_v58  ;;  %v681_v4 = vcombine.low %v85_v55, %v89_v56  ;;  %v683_v5 = vcombine.low %v86_v57, %v90_v58  ;;  %v784_v10 = vld [vmem:[%s804_s0] sm:$0xff]   ;;  %v60_v28 = vld [vmem:[#allocation2 + $0xf8] sm:$0xff]  ;;  %v63_v33 = vld [vmem:[#allocation2 + $0x110] sm:$0xff]  ;;  %s749_s0 = smov [#allocation5]  }
  0x24   :  { %426 = vmatpush1.bf16.msra.mxu0 %v649_v35  ;;  %469 = vmatpush1.bf16.msra.mxu1 %v651_v36  ;;  %v656_v32 = vcombine.high %v56_v27, %v60_v28  ;;  %v67_v34 = vld [vmem:[#allocation2 + $0x130] sm:$0xff]  ;;  %v64_v35 = vld [vmem:[#allocation2 + $0x118] sm:$0xff]  ;;  %s612_s24 = sshll.u32 %s749_s0, 4  ;;  %s613_s24 = int_to_ptr.vmem [resolvable:$true] %s612_s24 }
  0x25   :  { %427 = vmatprep.subr.bf16.mxu0 %v658_v37  ;;  %470 = vmatprep.subr.bf16.mxu1 %v660_v38  ;;  %v68_v36 = vld [vmem:[#allocation2 + $0x138] sm:$0xff]  ;;  %v653_v37 = vcombine.low %v55_v25, %v59_v26  ;;  %v655_v38 = vcombine.low %v56_v27, %v60_v28  ;;  %v662_v39 = vcombine.high %v63_v33, %v67_v34  ;;  %v71_v40 = vld [vmem:[#allocation2 + $0x150] sm:$0xff]  ;;  %s719_s25 = scalar_lea.vmem %s613_s24, 2048  ;;  %p724_p9 = scmp.lt.s32.totalorder %s613_s24, %s613_s24 }
  0x26   :  { %v75_v41 = vld [vmem:[#allocation2 + $0x170] sm:$0xff]  ;;  %v72_v42 = vld [vmem:[#allocation2 + $0x158] sm:$0xff]  ;;  %p720_p8 = scmp.ne.s32.totalorder %s613_s24, %s719_s25  ;;  %p725_p10 = scmp.lt.s32.totalorder %s719_s25, %s719_s25 }
  0x27   :  { %v79_v48 = vld [vmem:[#allocation2 + $0x190] sm:$0xff]  ;;  %v80_v50 = vld [vmem:[#allocation2 + $0x198] sm:$0xff] }
  0x28   :  { %428 = vmatpush1.bf16.msra.mxu0 %v657_v43  ;;  %471 = vmatpush1.bf16.msra.mxu1 %v659_v44  ;;  %v76_v43 = vld [vmem:[#allocation2 + $0x178] sm:$0xff]  ;;  %v661_v44 = vcombine.low %v63_v33, %v67_v34  ;;  %v83_v49 = vld [vmem:[#allocation2 + $0x1b0] sm:$0xff]  ;;  %p726_p11 = por %p725_p10, %p724_p9 }
  0x29   :  { %429 = vmatprep.subr.bf16.mxu0 %v666_v45  ;;  %472 = vmatprep.subr.bf16.mxu1 %v668_v46  ;;  %v663_v45 = vcombine.low %v64_v35, %v68_v36  ;;  %v670_v46 = vcombine.high %v71_v40, %v75_v41  ;;  %v672_v47 = vcombine.high %v72_v42, %v76_v43  ;;  %v87_v56 = vld [vmem:[#allocation2 + $0x1d0] sm:$0xff]  ;;  %v88_v58 = vld [vmem:[#allocation2 + $0x1d8] sm:$0xff] }
  0x2a   :  { %v91_v57 = vld [vmem:[#allocation2 + $0x1f0] sm:$0xff]  ;;  %p727_p12 = pnand %p726_p11, %p720_p8 }
  0x2b   :  { %v685_v1 = vcombine.low %v87_v56, %v91_v57 }
  0x2c   :  { %430 = vmatpush1.bf16.msra.mxu0 %v665_v51  ;;  %473 = vmatpush1.bf16.msra.mxu1 %v667_v52  ;;  %v84_v51 = vld [vmem:[#allocation2 + $0x1b8] sm:$0xff]  ;;  %v669_v52 = vcombine.low %v71_v40, %v75_v41 }
  0x2d   :  { %431 = vmatprep.subr.bf16.mxu0 %v674_v53  ;;  %474 = vmatprep.subr.bf16.mxu1 %v676_v54  ;;  %v671_v53 = vcombine.low %v72_v42, %v76_v43  ;;  %v678_v54 = vcombine.high %v79_v48, %v83_v49  ;;  %v680_v55 = vcombine.high %v80_v50, %v84_v51 }
  0x30   :  { %432 = vmatpush1.bf16.msra.mxu0 %v673_v59  ;;  %475 = vmatpush1.bf16.msra.mxu1 %v675_v60  ;;  %v92_v59 = vld [vmem:[#allocation2 + $0x1f8] sm:$0xff]  ;;  %v677_v60 = vcombine.low %v79_v48, %v83_v49 }
  0x31   :  { %433 = vmatprep.subr.bf16.mxu0 %v682_v61  ;;  %476 = vmatprep.subr.bf16.mxu1 %v684_v62  ;;  %v679_v61 = vcombine.low %v80_v50, %v84_v51  ;;  %v686_v62 = vcombine.high %v87_v56, %v91_v57  ;;  %v688_v63 = vcombine.high %v88_v58, %v92_v59 }
  0x32   :  { %v687_v2 = vcombine.low %v88_v58, %v92_v59 }
  0x34   :  { %434 = vmatpush1.bf16.msra.mxu0 %v681_v4  ;;  %477 = vmatpush1.bf16.msra.mxu1 %v683_v5 }
  0x35   :  { %505 = vmatprep.subr.bf16.mxu0 %v630_v6  ;;  %548 = vmatprep.subr.bf16.mxu1 %v632_v7 }
  0x37   :  { %452 = vmatmul.mubr.bf16.vlgmr.msra.gmra.mrb[0].mxu0 %v784_v10  ;;  %495 = vmatmul.mubr.bf16.vlgmr.msra.gmra.mrb[0].mxu1 %v784_v10 }
  0x38   :  { %506 = vmatpush1.bf16.msra.mxu0 %v629_v13  ;;  %549 = vmatpush1.bf16.msra.mxu1 %v631_v14 }
  0x39   :  { %507 = vmatprep.subr.bf16.mxu0 %v638_v15  ;;  %550 = vmatprep.subr.bf16.mxu1 %v640_v16 }
  0x3a   :  { %537 = vmatprep.mubr.bf16.mxu0 %v748_v0  ;;  %580 = vmatprep.mubr.bf16.mxu1 %v748_v0  ;;  %v664_v0 = vcombine.high %v64_v35, %v68_v36 }
  0x3c   :  { %508 = vmatpush1.bf16.msra.mxu0 %v637_v21  ;;  %551 = vmatpush1.bf16.msra.mxu1 %v639_v22 }
  0x3d   :  { %509 = vmatprep.subr.bf16.mxu0 %v646_v23  ;;  %552 = vmatprep.subr.bf16.mxu1 %v648_v24 }
  0x40   :  { %510 = vmatpush1.bf16.msra.mxu0 %v645_v29  ;;  %553 = vmatpush1.bf16.msra.mxu1 %v647_v30 }
  0x41   :  { %511 = vmatprep.subr.bf16.mxu0 %v654_v31  ;;  %554 = vmatprep.subr.bf16.mxu1 %v656_v32 }
  0x44   :  { %512 = vmatpush1.bf16.msra.mxu0 %v653_v37  ;;  %555 = vmatpush1.bf16.msra.mxu1 %v655_v38 }
  0x45   :  { %513 = vmatprep.subr.bf16.mxu0 %v662_v39  ;;  %556 = vmatprep.subr.bf16.mxu1 %v664_v0 }
  0x48   :  { %514 = vmatpush1.bf16.msra.mxu0 %v661_v44  ;;  %557 = vmatpush1.bf16.msra.mxu1 %v663_v45 }
  0x49   :  { %515 = vmatprep.subr.bf16.mxu0 %v670_v46  ;;  %558 = vmatprep.subr.bf16.mxu1 %v672_v47 }
  0x4c   :  { %516 = vmatpush1.bf16.msra.mxu0 %v669_v52  ;;  %559 = vmatpush1.bf16.msra.mxu1 %v671_v53 }
  0x4d   :  { %517 = vmatprep.subr.bf16.mxu0 %v678_v54  ;;  %560 = vmatprep.subr.bf16.mxu1 %v680_v55 }
  0x50   :  { %518 = vmatpush1.bf16.msra.mxu0 %v677_v60  ;;  %561 = vmatpush1.bf16.msra.mxu1 %v679_v61 }
  0x51   :  { %519 = vmatprep.subr.bf16.mxu0 %v686_v62  ;;  %562 = vmatprep.subr.bf16.mxu1 %v688_v63 }
  0x54   :  { %520 = vmatpush1.bf16.msra.mxu0 %v685_v1  ;;  %563 = vmatpush1.bf16.msra.mxu1 %v687_v2 }
  0x57   :  { %538 = vmatmul.mubr.bf16.vlgmr.msra.gmra.mrb[4].mxu0 %v784_v10  ;;  %581 = vmatmul.mubr.bf16.vlgmr.msra.gmra.mrb[4].mxu1 %v784_v10 }
 0x10a   :  { %v453_v3 = vpop.f32.mrb[0].mxu0  ;;  %v496_v4 = vpop.f32.mrb[0].mxu1 }
 0x10b   :  { %591 = vst [vmem:[#allocation5] sm:$0xff] %v453_v3  ;;  %v455_v5 = vpop.f32.mrb[1].mxu0  ;;  %593 = vst [vmem:[#allocation5 + $0x10] sm:$0xff] %v496_v4  ;;  %v498_v6 = vpop.f32.mrb[1].mxu1 }
 0x10c   :  { %592 = vst [vmem:[#allocation5 + $0x8] sm:$0xff] %v455_v5  ;;  %v457_v7 = vpop.f32.mrb[2].mxu0  ;;  %594 = vst [vmem:[#allocation5 + $0x18] sm:$0xff] %v498_v6  ;;  %v500_v8 = vpop.f32.mrb[2].mxu1 }
 0x10d   :  { %599 = vst [vmem:[#allocation5 + $0x40] sm:$0xff] %v457_v7  ;;  %v459_v9 = vpop.f32.mrb[3].mxu0  ;;  %601 = vst [vmem:[#allocation5 + $0x50] sm:$0xff] %v500_v8  ;;  %v502_v11 = vpop.f32.mrb[3].mxu1 }
 0x10e   :  { %600 = vst [vmem:[#allocation5 + $0x48] sm:$0xff] %v459_v9  ;;  %602 = vst [vmem:[#allocation5 + $0x58] sm:$0xff] %v502_v11 }
 0x12a   :  { %v539_v12 = vpop.f32.mrb[4].mxu0  ;;  %v582_v10 = vpop.f32.mrb[4].mxu1 }
 0x12b   :  { %595 = vst [vmem:[#allocation5 + $0x20] sm:$0xff] %v539_v12  ;;  %v541_v13 = vpop.f32.mrb[5].mxu0  ;;  %597 = vst [vmem:[#allocation5 + $0x30] sm:$0xff] %v582_v10  ;;  %v584_v14 = vpop.f32.mrb[5].mxu1 }
 0x12c   :  { %596 = vst [vmem:[#allocation5 + $0x28] sm:$0xff] %v541_v13  ;;  %v543_v15 = vpop.f32.mrb[6].mxu0  ;;  %598 = vst [vmem:[#allocation5 + $0x38] sm:$0xff] %v584_v14  ;;  %v586_v16 = vpop.f32.mrb[6].mxu1 }
 0x12d   :  { %603 = vst [vmem:[#allocation5 + $0x60] sm:$0xff] %v543_v15  ;;  %v545_v17 = vpop.f32.mrb[7].mxu0  ;;  %605 = vst [vmem:[#allocation5 + $0x70] sm:$0xff] %v586_v16  ;;  %v588_v18 = vpop.f32.mrb[7].mxu1 }
 0x12e   :  { %604 = vst [vmem:[#allocation5 + $0x68] sm:$0xff] %v545_v17  ;;  %606 = vst [vmem:[#allocation5 + $0x78] sm:$0xff] %v588_v18 }
 0x12f   :  { %730 = shalt.err (!%p727_p12)
}
 0x130   :  { %s731_s28 = scalar_lea.hbm %s806_s2, 2048 }
 0x131   :  { %p732_p13 = scmp.ne.s32.totalorder %s806_s2, %s731_s28  ;;  %p735_p0 = scmp.lt.u32.totalorder %s731_s28, %s806_s2 }
 0x133   :  { %p737_p1 = pnand %p735_p0, %p732_p13 }
 0x135   :  { %740 = shalt.err (!%p737_p1)
}
 0x136   :  { %s750_s5 = smov 1024   ;;  %s751_s6 = smov 64  }
 0x137   :  { %618 = dma.vmem_to_hbm [thread:$0]  %s613_s24, 2048, %s806_s2, [#allocation4], %s750_s5, %s750_s5, %s751_s6  }
 0x138   :  { %743 = dma.done.wait [#allocation4], 2048  }
 0x139   :  { %744 = vsyncadd [#allocation4], 4294965248 }
 0x13a   :  { %622 = vsyncpa [#allocation3], 1 }
 0x13b   :  { %623 = vsyncpa [#allocation4], 1 }

</bundles_post_ra>
